<compile_context>
chip_gen: v6e
topology: v6e:2x2x1
jax: 0.10.0
libtpu: 0.0.40
codegen_flags: <defaults>
</compile_context>

<pallas_src>
import math

import jax
import jax.numpy as jnp
from jax.experimental import pallas as pl
from jax.experimental.pallas import tpu as pltpu

OBS_DIM = 339 * 2           # 678
ACT_DIM = 22
IN_DIM = OBS_DIM + ACT_DIM  # 700
H1 = 512
H2 = 256
OUT_DIM = 1


def _cdiv(a, b):
    return -(-a // b)


def _round_up(x, m):
    return ((x + m - 1) // m) * m


def _choose_tile(B, block_b):
    """Pick (TB, n_steps) for the batch grid.

    - B <= 128: one exact full-array block (no padding, no partial loads).
    - B  > 128: TB is a multiple of 128 (lane-dense output blocks), capped at block_b,
      and sized so the grid has >= 2 steps (dual-TC v7x) with minimal last-tile waste.
    """
    if B <= 128:
        return B, 1
    block_b = max(128, (block_b // 128) * 128)
    n_steps = max(2, _cdiv(B, block_b))
    tb = min(block_b, _round_up(_cdiv(B, n_steps), 128))
    n_steps = _cdiv(B, tb)
    return tb, n_steps


def _critic_kernel(obs_ref, act_ref, w1o_ref, w1a_ref, b1_ref,
                   w2_ref, b2_ref, wq_ref, bq_ref, q_ref):
    bf16 = jnp.bfloat16
    obs = obs_ref[...].astype(bf16)          # (TB, 678)
    act = act_ref[...].astype(bf16)          # (TB, 22)

    # Layer 1: split-K matmul replaces the concat; f32 accumulation on the MXU.
    h1 = jnp.dot(obs, w1o_ref[...], preferred_element_type=jnp.float32)
    h1 = h1 + jnp.dot(act, w1a_ref[...], preferred_element_type=jnp.float32)
    h1 = jnp.maximum(h1 + b1_ref[...], 0.0)  # (TB, 512) f32

    # Layer 2.
    h2 = jnp.dot(h1.astype(bf16), w2_ref[...], preferred_element_type=jnp.float32)
    h2 = jnp.maximum(h2 + b2_ref[...], 0.0)  # (TB, 256) f32

    # Output layer: contract the 256-dim of (1,256) and (TB,256) -> (1, TB).
    # Batch lands on the lane axis, so the store is a full-width vst rather than a
    # masked (TB, 1) column store.  bq is a scalar read from SMEM.
    q = jax.lax.dot_general(
        wq_ref[...], h2.astype(bf16),
        dimension_numbers=(((1,), (1,)), ((), ())),
        preferred_element_type=jnp.float32)  # (1, TB)
    q_ref[...] = q + bq_ref[0]


def critic_forward(input_obs, input_act, params, *, block_b=1024):
    """Pallas Critic.forward: (B,678) f32, (B,22) f32 -> (B,1) f32."""
    w1o, w1a, b1, w2, b2, wq, bq = params
    B = input_obs.shape[0]

    TB, n_steps = _choose_tile(B, block_b)
    B_out = n_steps * TB            # only the tiny output row is over-allocated

    resident = lambda i: (0, 0)     # weights/biases: same block every step -> no re-DMA

    weight_bytes = (OBS_DIM * H1 + ACT_DIM * H1 + H1 * H2 + H2) * 2 \
        + (H1 + H2 + 1) * 4
    cost = pl.CostEstimate(
        flops=2 * B_out * (OBS_DIM * H1 + ACT_DIM * H1 + H1 * H2 + H2 * OUT_DIM),
        transcendentals=0,
        bytes_accessed=B * (OBS_DIM + ACT_DIM) * 4 + weight_bytes + B_out * 4)

    q_row = pl.pallas_call(
        _critic_kernel,
        out_shape=jax.ShapeDtypeStruct((1, B_out), jnp.float32),
        grid_spec=pltpu.PrefetchScalarGridSpec(
            num_scalar_prefetch=0,
            grid=(n_steps,),
            in_specs=[
                pl.BlockSpec((TB, OBS_DIM), lambda i: (i, 0)),
                pl.BlockSpec((TB, ACT_DIM), lambda i: (i, 0)),
                pl.BlockSpec((OBS_DIM, H1), resident),
                pl.BlockSpec((ACT_DIM, H1), resident),
                pl.BlockSpec((1, H1), resident),
                pl.BlockSpec((H1, H2), resident),
                pl.BlockSpec((1, H2), resident),
                pl.BlockSpec((1, H2), resident),   # wq stored as a (1, 256) row
                pl.BlockSpec(memory_space=pltpu.MemorySpace.SMEM),  # bq scalar
            ],
            out_specs=pl.BlockSpec((1, TB), lambda i: (0, i)),
        ),
        compiler_params=pltpu.CompilerParams(
            dimension_semantics=("parallel",),
            vmem_limit_bytes=48 * 1024 * 1024),
        cost_estimate=cost,
    )(input_obs, input_act, w1o, w1a, b1, w2, b2, wq, bq)

    return q_row[0, :B][:, None]


def init_params(key):
    """PyTorch nn.Linear-style init (U[-1/sqrt(fan_in), 1/sqrt(fan_in)]).

    Weights are stored (in_features, out_features) in bf16; biases stay f32.
    W1 is split into obs/act halves so the kernel never needs a concat, the final-layer
    weight is a (1, 256) row (lane-dense output tile), and bq is a (1,) scalar for SMEM.
    """
    ks = jax.random.split(key, 6)

    def linear(kw, kb, fan_in, fan_out):
        bound = 1.0 / math.sqrt(fan_in)
        w = jax.random.uniform(kw, (fan_in, fan_out), jnp.float32, -bound, bound)
        b = jax.random.uniform(kb, (1, fan_out), jnp.float32, -bound, bound)
        return w, b

    w1, b1 = linear(ks[0], ks[1], IN_DIM, H1)
    w2, b2 = linear(ks[2], ks[3], H1, H2)
    wq, bq = linear(ks[4], ks[5], H2, OUT_DIM)

    bf16 = jnp.bfloat16
    w1o = w1[:OBS_DIM].astype(bf16)     # (678, 512)
    w1a = w1[OBS_DIM:].astype(bf16)     # (22, 512)
    wq_row = wq.T.astype(bf16)          # (1, 256)
    bq_s = bq[0]                        # (1,) f32 scalar bias
    return (w1o, w1a, b1, w2.astype(bf16), b2, wq_row, bq_s)


def critic_reference(input_obs, input_act, params):
    """Pure-JAX f32 reference matching the original PyTorch forward."""
    w1o, w1a, b1, w2, b2, wq, bq = params
    f32 = jnp.float32
    x = jnp.concatenate((input_obs, input_act), axis=1)
    w1 = jnp.concatenate((w1o.astype(f32), w1a.astype(f32)), axis=0)
    h1 = jnp.maximum(x @ w1 + b1, 0.0)
    h2 = jnp.maximum(h1 @ w2.astype(f32) + b2, 0.0)
    return h2 @ wq.astype(f32).T + bq


if __name__ == "__main__":
    key = jax.random.PRNGKey(0)
    k_obs, k_act, k_params, k_obs2, k_act2 = jax.random.split(key, 5)
    params = init_params(k_params)

    # Small demo batch: single exact block, no padding.
    B = 2
    obs = jax.random.normal(k_obs, (B, OBS_DIM), jnp.float32)
    act = jax.random.normal(k_act, (B, ACT_DIM), jnp.float32)
    q = jax.block_until_ready(critic_forward(obs, act, params))
    q_ref = critic_reference(obs, act, params)
    assert q.shape == (B, 1)
    assert jnp.allclose(q, q_ref, atol=3e-2, rtol=3e-2), \
        float(jnp.max(jnp.abs(q - q_ref)))

    # Ragged batch: 2 grid steps (TB=256), last input block partially out-of-bounds,
    # exercising the no-pad boundary-block path and the adaptive tile choice.
    B2 = 333
    obs2 = jax.random.normal(k_obs2, (B2, OBS_DIM), jnp.float32)
    act2 = jax.random.normal(k_act2, (B2, ACT_DIM), jnp.float32)
    q2 = jax.block_until_ready(critic_forward(obs2, act2, params))
    q2_ref = critic_reference(obs2, act2, params)
    assert q2.shape == (B2, 1)
    assert jnp.allclose(q2, q2_ref, atol=3e-2, rtol=3e-2), \
        float(jnp.max(jnp.abs(q2 - q2_ref)))

    print("KERNEL_OK")
</pallas_src>

<mosaic_0001>
module attributes {stable_mosaic.version = 11 : i64} {
  func.func @_critic_kernel(%arg0: i32, %arg1: memref<2x678xf32, #tpu.memory_space<vmem>>, %arg2: memref<2x22xf32, #tpu.memory_space<vmem>>, %arg3: memref<678x512xbf16, #tpu.memory_space<vmem>>, %arg4: memref<22x512xbf16, #tpu.memory_space<vmem>>, %arg5: memref<1x512xf32, #tpu.memory_space<vmem>>, %arg6: memref<512x256xbf16, #tpu.memory_space<vmem>>, %arg7: memref<1x256xf32, #tpu.memory_space<vmem>>, %arg8: memref<1x256xbf16, #tpu.memory_space<vmem>>, %arg9: memref<1xf32, #tpu.memory_space<smem>>, %arg10: memref<1x2xf32, #tpu.memory_space<vmem>>) attributes {dimension_semantics = [#tpu.dimension_semantics<parallel>], iteration_bounds = array<i64: 1>, scalar_prefetch = 0 : i64, scratch_operands = 0 : i64, tpu.core_type = #tpu.core_type<tc>, window_params = [{transform_indices = @transform_0, window_bounds = array<i64: 2, 678>}, {transform_indices = @transform_1, window_bounds = array<i64: 2, 22>}, {pipeline_mode = #tpu.pipeline_mode<synchronous>, transform_indices = @transform_2, window_bounds = array<i64: 678, 512>}, {pipeline_mode = #tpu.pipeline_mode<synchronous>, transform_indices = @transform_3, window_bounds = array<i64: 22, 512>}, {pipeline_mode = #tpu.pipeline_mode<synchronous>, transform_indices = @transform_4, window_bounds = array<i64: 1, 512>}, {pipeline_mode = #tpu.pipeline_mode<synchronous>, transform_indices = @transform_5, window_bounds = array<i64: 512, 256>}, {pipeline_mode = #tpu.pipeline_mode<synchronous>, transform_indices = @transform_6, window_bounds = array<i64: 1, 256>}, {pipeline_mode = #tpu.pipeline_mode<synchronous>, transform_indices = @transform_7, window_bounds = array<i64: 1, 256>}, {transform_indices = @transform_8, window_bounds = array<i64: 1>}, {transform_indices = @transform_9, window_bounds = array<i64: 1, 2>}]} {
    %c0 = arith.constant 0 : index
    %c0_0 = arith.constant 0 : index
    %0 = vector.load %arg1[%c0, %c0_0] : memref<2x678xf32, #tpu.memory_space<vmem>>, vector<2x678xf32>
    %1 = arith.truncf %0 : vector<2x678xf32> to vector<2x678xbf16>
    %c0_1 = arith.constant 0 : index
    %c0_2 = arith.constant 0 : index
    %2 = vector.load %arg2[%c0_1, %c0_2] : memref<2x22xf32, #tpu.memory_space<vmem>>, vector<2x22xf32>
    %3 = arith.truncf %2 : vector<2x22xf32> to vector<2x22xbf16>
    %c0_3 = arith.constant 0 : index
    %c0_4 = arith.constant 0 : index
    %4 = vector.load %arg3[%c0_3, %c0_4] : memref<678x512xbf16, #tpu.memory_space<vmem>>, vector<678x512xbf16>
    %cst = arith.constant dense<0.000000e+00> : vector<2x512xf32>
    %5 = tpu.matmul %1, %4, %cst {dimension_numbers = #tpu.dot_dimension_numbers<[1], [0], [0], [1], [0, 0, 1, 1], [], []>} : vector<2x678xbf16>, vector<678x512xbf16>, vector<2x512xf32> -> vector<2x512xf32>
    %c0_5 = arith.constant 0 : index
    %c0_6 = arith.constant 0 : index
    %6 = vector.load %arg4[%c0_5, %c0_6] : memref<22x512xbf16, #tpu.memory_space<vmem>>, vector<22x512xbf16>
    %cst_7 = arith.constant dense<0.000000e+00> : vector<2x512xf32>
    %7 = tpu.matmul %3, %6, %cst_7 {dimension_numbers = #tpu.dot_dimension_numbers<[1], [0], [0], [1], [0, 0, 1, 1], [], []>} : vector<2x22xbf16>, vector<22x512xbf16>, vector<2x512xf32> -> vector<2x512xf32>
    %8 = arith.addf %5, %7 : vector<2x512xf32>
    %c0_8 = arith.constant 0 : index
    %c0_9 = arith.constant 0 : index
    %9 = vector.load %arg5[%c0_8, %c0_9] : memref<1x512xf32, #tpu.memory_space<vmem>>, vector<1x512xf32>
    %10 = vector.broadcast %9 : vector<1x512xf32> to vector<2x512xf32>
    %11 = arith.addf %8, %10 : vector<2x512xf32>
    %cst_10 = arith.constant 0.000000e+00 : f32
    %12 = vector.broadcast %cst_10 : f32 to vector<2x512xf32>
    %13 = arith.maximumf %11, %12 : vector<2x512xf32>
    %14 = arith.truncf %13 : vector<2x512xf32> to vector<2x512xbf16>
    %c0_11 = arith.constant 0 : index
    %c0_12 = arith.constant 0 : index
    %15 = vector.load %arg6[%c0_11, %c0_12] : memref<512x256xbf16, #tpu.memory_space<vmem>>, vector<512x256xbf16>
    %cst_13 = arith.constant dense<0.000000e+00> : vector<2x256xf32>
    %16 = tpu.matmul %14, %15, %cst_13 {dimension_numbers = #tpu.dot_dimension_numbers<[1], [0], [0], [1], [0, 0, 1, 1], [], []>} : vector<2x512xbf16>, vector<512x256xbf16>, vector<2x256xf32> -> vector<2x256xf32>
    %c0_14 = arith.constant 0 : index
    %c0_15 = arith.constant 0 : index
    %17 = vector.load %arg7[%c0_14, %c0_15] : memref<1x256xf32, #tpu.memory_space<vmem>>, vector<1x256xf32>
    %18 = vector.broadcast %17 : vector<1x256xf32> to vector<2x256xf32>
    %19 = arith.addf %16, %18 : vector<2x256xf32>
    %cst_16 = arith.constant 0.000000e+00 : f32
    %20 = vector.broadcast %cst_16 : f32 to vector<2x256xf32>
    %21 = arith.maximumf %19, %20 : vector<2x256xf32>
    %c0_17 = arith.constant 0 : index
    %c0_18 = arith.constant 0 : index
    %22 = vector.load %arg8[%c0_17, %c0_18] : memref<1x256xbf16, #tpu.memory_space<vmem>>, vector<1x256xbf16>
    %23 = arith.truncf %21 : vector<2x256xf32> to vector<2x256xbf16>
    %cst_19 = arith.constant dense<0.000000e+00> : vector<1x2xf32>
    %24 = tpu.matmul %22, %23, %cst_19 {dimension_numbers = #tpu.dot_dimension_numbers<[1], [1], [0], [0], [0, 0, 1, 0], [], []>} : vector<1x256xbf16>, vector<2x256xbf16>, vector<1x2xf32> -> vector<1x2xf32>
    %c0_20 = arith.constant 0 : index
    %25 = memref.load %arg9[%c0_20] : memref<1xf32, #tpu.memory_space<smem>>
    %26 = vector.broadcast %25 : f32 to vector<1x2xf32>
    %27 = arith.addf %24, %26 : vector<1x2xf32>
    %c0_21 = arith.constant 0 : index
    %c0_22 = arith.constant 0 : index
    %28 = vector.load %arg10[%c0_21, %c0_22] : memref<1x2xf32, #tpu.memory_space<vmem>>, vector<1x2xf32>
    tpu.vector_store %arg10[%c0_21, %c0_22], %27 {strides = array<i32>} : memref<1x2xf32, #tpu.memory_space<vmem>>, vector<1x2xf32>,
    return
  }
  func.func @transform_0(%arg0: i32) -> (i32, i32) {
    %c0_i32 = arith.constant 0 : i32
    %c0_i32_0 = arith.constant 0 : i32
    return %arg0, %c0_i32 : i32, i32
  }
  func.func @transform_1(%arg0: i32) -> (i32, i32) {
    %c0_i32 = arith.constant 0 : i32
    %c0_i32_0 = arith.constant 0 : i32
    return %arg0, %c0_i32 : i32, i32
  }
  func.func @transform_2(%arg0: i32) -> (i32, i32) {
    %c0_i32 = arith.constant 0 : i32
    %c0_i32_0 = arith.constant 0 : i32
    %c0_i32_1 = arith.constant 0 : i32
    return %c0_i32, %c0_i32_0 : i32, i32
  }
  func.func @transform_3(%arg0: i32) -> (i32, i32) {
    %c0_i32 = arith.constant 0 : i32
    %c0_i32_0 = arith.constant 0 : i32
    %c0_i32_1 = arith.constant 0 : i32
    return %c0_i32, %c0_i32_0 : i32, i32
  }
  func.func @transform_4(%arg0: i32) -> (i32, i32) {
    %c0_i32 = arith.constant 0 : i32
    %c0_i32_0 = arith.constant 0 : i32
    %c0_i32_1 = arith.constant 0 : i32
    return %c0_i32, %c0_i32_0 : i32, i32
  }
  func.func @transform_5(%arg0: i32) -> (i32, i32) {
    %c0_i32 = arith.constant 0 : i32
    %c0_i32_0 = arith.constant 0 : i32
    %c0_i32_1 = arith.constant 0 : i32
    return %c0_i32, %c0_i32_0 : i32, i32
  }
  func.func @transform_6(%arg0: i32) -> (i32, i32) {
    %c0_i32 = arith.constant 0 : i32
    %c0_i32_0 = arith.constant 0 : i32
    %c0_i32_1 = arith.constant 0 : i32
    return %c0_i32, %c0_i32_0 : i32, i32
  }
  func.func @transform_7(%arg0: i32) -> (i32, i32) {
    %c0_i32 = arith.constant 0 : i32
    %c0_i32_0 = arith.constant 0 : i32
    %c0_i32_1 = arith.constant 0 : i32
    return %c0_i32, %c0_i32_0 : i32, i32
  }
  func.func @transform_8(%arg0: i32) -> i32 {
    %c0_i32 = arith.constant 0 : i32
    %c0_i32_0 = arith.constant 0 : i32
    return %c0_i32 : i32
  }
  func.func @transform_9(%arg0: i32) -> (i32, i32) {
    %c0_i32 = arith.constant 0 : i32
    %c0_i32_0 = arith.constant 0 : i32
    return %c0_i32, %arg0 : i32, i32
  }
}

</mosaic_0001>

<bundles_post_ra>
// kernel: tpu_custom_call.1
= control target key start
LH: loop header
LB: loop body
LE: loop exit
PB: predicated region body
PF: predicated region fallthrough
CT: control target
= control target key end

     0   :  { %15 = vsyncpa [#allocation4], 0  ;;  %s3048_s0 = inlined_call_operand.hbm [shape: f32[2,678], index: 0, kind: input, shape index: {}]   ;;  %s3049_s1 = inlined_call_operand.vmem [shape: f32[2,22], index: 1, kind: input, shape index: {}]   ;;  %s3050_s2 = inlined_call_operand.hbm [shape: bf16[678,512], index: 2, kind: input, shape index: {}]   ;;  %s3051_s3 = inlined_call_operand.hbm [shape: bf16[22,512], index: 3, kind: input, shape index: {}]   ;;  %s3052_s4 = inlined_call_operand.vmem [shape: f32[1,512], index: 4, kind: input, shape index: {}]   ;;  %s3053_s5 = inlined_call_operand.hbm [shape: bf16[512,256], index: 5, kind: input, shape index: {}]   ;;  %s3054_s6 = inlined_call_operand.vmem [shape: f32[1,256], index: 6, kind: input, shape index: {}]   ;;  %s3055_s7 = inlined_call_operand.vmem [shape: bf16[1,256], index: 7, kind: input, shape index: {}]   ;;  %s3056_s8 = inlined_call_operand.<no memory space> [shape: f32[1], index: 8, kind: input, shape index: {}]   ;;  %s3057_s9 = inlined_call_operand.hbm [shape: f32[1,2], index: 9, kind: output, shape index: {}]  }
   0x1   :  { %16 = vsyncpa [#allocation7], 0 }
   0x2   :  { %17 = vsyncpa [#allocation10], 0 }
   0x3   :  { %18 = vsyncpa [#allocation5], 0  ;;  %s2888_s30 = smov [#allocation6]  }
   0x4   :  { %s36_s10 = sshll.u32 %s2888_s30, 4  ;;  %s37_s10 = int_to_ptr.vmem [resolvable:$true] %s36_s10 }
   0x5   :  { %s2788_s11 = scalar_lea.vmem %s37_s10, 21760  ;;  %p2793_p1 = scmp.lt.s32.totalorder %s37_s10, %s37_s10 }
   0x6   :  { %p2789_p0 = scmp.ne.s32.totalorder %s37_s10, %s2788_s11  ;;  %p2794_p2 = scmp.lt.s32.totalorder %s2788_s11, %s2788_s11 }
   0x8   :  { %p2795_p3 = por %p2794_p2, %p2793_p1 }
   0xa   :  { %p2796_p4 = pnand %p2795_p3, %p2789_p0 }
   0xc   :  { %2799 = shalt.err (!%p2796_p4)
}
   0xd   :  { %s2889_s12 = smov 256   ;;  %s2890_s13 = smov 16  }
   0xe   :  { %42 = dma.hbm_to_vmem [thread:$0]  %s3050_s2, 21760, %s37_s10, [#allocation7], %s2889_s12, %s2889_s12, %s2890_s13  }
   0xf   :  { %s2891_s16 = smov [#allocation3]   ;;  %s2892_s18 = smov [#allocation8]  }
  0x10   :  { %s25_s17 = sshll.u32 %s2891_s16, 4  ;;  %s48_s19 = sshll.u32 %s2892_s18, 4  ;;  %s26_s17 = int_to_ptr.vmem [resolvable:$true] %s25_s17  ;;  %s49_s19 = int_to_ptr.vmem [resolvable:$true] %s48_s19 }
  0x11   :  { %s2808_s20 = scalar_lea.vmem %s26_s17, 192  ;;  %p2813_p6 = scmp.lt.s32.totalorder %s26_s17, %s26_s17 }
  0x12   :  { %p2809_p5 = scmp.ne.s32.totalorder %s26_s17, %s2808_s20  ;;  %p2814_p7 = scmp.lt.s32.totalorder %s2808_s20, %s2808_s20 }
  0x14   :  { %p2815_p8 = por %p2814_p7, %p2813_p6 }
  0x16   :  { %p2816_p9 = pnand %p2815_p8, %p2809_p5 }
  0x18   :  { %2819 = shalt.err (!%p2816_p9)
}
  0x19   :  { %28 = dma.hbm_to_vmem [thread:$0]  %s3048_s0, 192, %s26_s17, [#allocation4]  }
  0x1a   :  { %s2828_s23 = scalar_lea.vmem %s49_s19, 768  ;;  %p2833_p11 = scmp.lt.s32.totalorder %s49_s19, %s49_s19 }
  0x1b   :  { %p2829_p10 = scmp.ne.s32.totalorder %s49_s19, %s2828_s23  ;;  %p2834_p12 = scmp.lt.s32.totalorder %s2828_s23, %s2828_s23 }
  0x1d   :  { %p2835_p13 = por %p2834_p12, %p2833_p11 }
  0x1f   :  { %p2836_p0 = pnand %p2835_p13, %p2829_p10 }
  0x21   :  { %2839 = shalt.err (!%p2836_p0)
}
  0x22   :  { %54 = dma.hbm_to_vmem [thread:$0]  %s3051_s3, 768, %s49_s19, [#allocation7], %s2889_s12, %s2889_s12, %s2890_s13  }
  0x23   :  { %s2893_s25 = smov [#allocation9]  }
  0x24   :  { %s62_s26 = sshll.u32 %s2893_s25, 4  ;;  %s63_s26 = int_to_ptr.vmem [resolvable:$true] %s62_s26 }
  0x25   :  { %s2848_s27 = scalar_lea.vmem %s63_s26, 8192  ;;  %p2853_p2 = scmp.lt.s32.totalorder %s63_s26, %s63_s26 }
  0x26   :  { %p2849_p1 = scmp.ne.s32.totalorder %s63_s26, %s2848_s27  ;;  %p2854_p3 = scmp.lt.s32.totalorder %s2848_s27, %s2848_s27 }
  0x28   :  { %p2855_p4 = por %p2854_p3, %p2853_p2 }
  0x2a   :  { %p2856_p5 = pnand %p2855_p4, %p2849_p1 }
  0x2c   :  { %2859 = shalt.err (!%p2856_p5)
}
  0x2d   :  { %s2894_s0 = smov 128   ;;  %s2895_s28 = smov 8  }
  0x2e   :  { %68 = dma.hbm_to_vmem [thread:$0]  %s3053_s5, 8192, %s63_s26, [#allocation10], %s2894_s0, %s2894_s0, %s2895_s28  }
  0x2f   :  { %2880 = dma.done.wait [#allocation4], 192  }
  0x30   :  { %2881 = vsyncadd [#allocation4], 4294967104 }
  0x31   :  { %2882 = dma.done.wait [#allocation7], 22528  }
  0x32   :  { %2883 = vsyncadd [#allocation7], 4294944768 }
  0x33   :  { %2884 = dma.done.wait [#allocation10], 8192  }
  0x34   :  { %2885 = vsyncadd [#allocation10], 4294959104  ;;  %v2896_v0 = vmov 0   ;;  %v305_v1 = vld [vmem:[#allocation8 + $0x20] sm:$0x77]  ;;  %vm341_vm0 = vcmask 1042432   ;;  %v96_v49 = vlaneseq }
  0x35   :  { %386 = vmatprep.mubr.bf16.mxu0 %v2896_v0  ;;  %427 = vmatprep.mubr.bf16.mxu1 %v2896_v0  ;;  %v306_v2 = vld [vmem:[#allocation8 + $0x28] sm:$0x77]  ;;  %v2157_v3 = vcombine.high %v305_v1, %v305_v1  ;;  %v2156_v5 = vcombine.low %v305_v1, %v305_v1  ;;  %v2421_v7 = vld [vmem:[#allocation8 + $0x4] ss:$16 sps:$4 sm:$0xff]   ;;  %v2425_v11 = vld [vmem:[#allocation8] ss:$16 sps:$4 sm:$0xff]  }
  0x36   :  { %v2159_v4 = vcombine.high %v306_v2, %v306_v2  ;;  %v2158_v6 = vcombine.low %v306_v2, %v306_v2  ;;  %v2423_v8 = vld [vmem:[#allocation8 + $0xc] ss:$16 sps:$4 sm:$0xff]   ;;  %v2426_v12 = vld [vmem:[#allocation8 + $0x8] ss:$16 sps:$4 sm:$0xff]   ;;  %v129_v13 = vld [vmem:[%s3049_s1] sm:$0x3] }
  0x37   :  { %2160 = vmatprep.subr.msk.bf16.mxu0 %vm341_vm0, %v2157_v3  ;;  %v343_v9 = vsel %vm341_vm0, %v2156_v5, 0  ;;  %v2429_v14 = vld [vmem:[#allocation6 + $0xe4] ss:$16 sps:$4 sm:$0xff]   ;;  %v130_v16 = vpack.c.bf16 %v129_v13, %v129_v13  ;;  %v2427_v17 = vld [vmem:[#allocation6 + $0xe0] ss:$16 sps:$4 sm:$0xff]   ;;  %vm337_vm1 = vcmask 179200  }
  0x38   :  { %2162 = vmatprep.subr.msk.bf16.mxu1 %vm341_vm0, %v2159_v4  ;;  %v349_v10 = vsel %vm341_vm0, %v2158_v6, 0  ;;  %367 = vmatpush1.bf16.msra.mxu0 %v343_v9  ;;  %v2432_v15 = vld [vmem:[#allocation6 + $0x2e4] ss:$16 sps:$4 sm:$0xff]   ;;  %v2430_v18 = vld [vmem:[#allocation6 + $0x2e0] ss:$16 sps:$4 sm:$0xff]   ;;  %v2969_v55 = vshrl.u32 %v96_v49, 7 }
  0x39   :  { %408 = vmatpush1.bf16.msra.mxu1 %v349_v10  ;;  %368 = vmatprep.subr.bf16.mxu0 %v2421_v7  ;;  %v2435_v19 = vld [vmem:[#allocation6 + $0xc4] ss:$16 sps:$4 sm:$0xff]   ;;  %v2433_v21 = vld [vmem:[#allocation6 + $0xc0] ss:$16 sps:$4 sm:$0xff]   ;;  %v2897_v47 = vmov 1983009808  }
  0x3a   :  { %409 = vmatprep.subr.bf16.mxu1 %v2423_v8  ;;  %v2438_v20 = vld [vmem:[#allocation6 + $0x2c4] ss:$16 sps:$4 sm:$0xff]   ;;  %v2436_v22 = vld [vmem:[#allocation6 + $0x2c0] ss:$16 sps:$4 sm:$0xff]   ;;  %v94_v48 = vunpack.c.l.s4 %v2897_v47  ;;  %vm1286_vm2 = vcmask 310272   ;;  %s2899_s14 = smov [#allocation11]  }
  0x3b   :  { %v2441_v23 = vld [vmem:[#allocation6 + $0xa4] ss:$16 sps:$4 sm:$0xff]   ;;  %v2439_v25 = vld [vmem:[#allocation6 + $0xa0] ss:$16 sps:$4 sm:$0xff]   ;;  %v2547_v47 = vld [vmem:[#allocation6 + $0x8c] ss:$16 sps:$4 sm:$0xff]  }
  0x3c   :  { %369 = vmatpush1.bf16.msra.mxu0 %v2425_v11  ;;  %v2444_v24 = vld [vmem:[#allocation6 + $0x2a4] ss:$16 sps:$4 sm:$0xff]   ;;  %v2442_v26 = vld [vmem:[#allocation6 + $0x2a0] ss:$16 sps:$4 sm:$0xff]   ;;  %v95_v54 = vunpack.c.0.s8 %v94_v48  ;;  %v2545_v49 = vld [vmem:[#allocation6 + $0x88] ss:$16 sps:$4 sm:$0xff]  }
  0x3d   :  { %410 = vmatpush1.bf16.msra.mxu1 %v2426_v12  ;;  %1302 = vmatprep.subr.bf16.mxu0 %v2429_v14  ;;  %v2447_v27 = vld [vmem:[#allocation6 + $0x84] ss:$16 sps:$4 sm:$0xff]   ;;  %v2445_v29 = vld [vmem:[#allocation6 + $0x80] ss:$16 sps:$4 sm:$0xff]   ;;  %s2140_s15 = sshll.u32 %s2899_s14, 4  ;;  %vm2132_vm3 = vcmask 8192   ;;  %s2141_s15 = int_to_ptr.vmem [resolvable:$true] %s2140_s15 }
  0x3e   :  { %1343 = vmatprep.subr.bf16.mxu1 %v2432_v15  ;;  %v2450_v28 = vld [vmem:[#allocation6 + $0x284] ss:$16 sps:$4 sm:$0xff]   ;;  %v2448_v30 = vld [vmem:[#allocation6 + $0x280] ss:$16 sps:$4 sm:$0xff]   ;;  %v98_v60 = vsub.s32 %v95_v54, %v2969_v55  ;;  %s2860_s16 = scalar_lea.vmem %s2141_s15, 16  ;;  %s2864_s17 = scalar_lea.vmem %s2141_s15, 32 }
  0x3f   :  { %2161 = vmatmul.mubr.msk.bf16.vlgmr.msra.gmra.mxu0 %vm337_vm1, %v130_v16  ;;  %v2453_v31 = vld [vmem:[#allocation6 + $0x64] ss:$16 sps:$4 sm:$0xff]   ;;  %v2451_v33 = vld [vmem:[#allocation6 + $0x60] ss:$16 sps:$4 sm:$0xff]   ;;  %p2861_p6 = scmp.ne.s32.totalorder %s2141_s15, %s2860_s16  ;;  %p2865_p7 = scmp.lt.s32.totalorder %s2141_s15, %s2141_s15 }
  0x40   :  { %2163 = vmatmul.mubr.msk.bf16.vlgmr.msra.gmra.mxu1 %vm337_vm1, %v130_v16  ;;  %1303 = vmatpush1.bf16.msra.mxu0 %v2427_v17  ;;  %v2456_v32 = vld [vmem:[#allocation6 + $0x264] ss:$16 sps:$4 sm:$0xff]   ;;  %v2454_v34 = vld [vmem:[#allocation6 + $0x260] ss:$16 sps:$4 sm:$0xff]   ;;  %p2866_p8 = scmp.lt.s32.totalorder %s2864_s17, %s2860_s16 }
  0x41   :  { %1344 = vmatpush1.bf16.msra.mxu1 %v2430_v18  ;;  %1304 = vmatprep.subr.bf16.mxu0 %v2435_v19  ;;  %v2459_v35 = vld [vmem:[#allocation6 + $0x44] ss:$16 sps:$4 sm:$0xff]   ;;  %v2457_v37 = vld [vmem:[#allocation6 + $0x40] ss:$16 sps:$4 sm:$0xff]  }
  0x42   :  { %1345 = vmatprep.subr.bf16.mxu1 %v2438_v20  ;;  %v2462_v36 = vld [vmem:[#allocation6 + $0x244] ss:$16 sps:$4 sm:$0xff]   ;;  %v2460_v38 = vld [vmem:[#allocation6 + $0x240] ss:$16 sps:$4 sm:$0xff]   ;;  %p2867_p9 = por %p2866_p8, %p2865_p7 }
  0x43   :  { %v2465_v39 = vld [vmem:[#allocation6 + $0x24] ss:$16 sps:$4 sm:$0xff]   ;;  %v2463_v41 = vld [vmem:[#allocation6 + $0x20] ss:$16 sps:$4 sm:$0xff]  }
  0x44   :  { %1305 = vmatpush1.bf16.msra.mxu0 %v2433_v21  ;;  %v2468_v40 = vld [vmem:[#allocation6 + $0x224] ss:$16 sps:$4 sm:$0xff]   ;;  %v2466_v42 = vld [vmem:[#allocation6 + $0x220] ss:$16 sps:$4 sm:$0xff]   ;;  %p2868_p10 = pnand %p2867_p9, %p2861_p6 }
  0x45   :  { %1346 = vmatpush1.bf16.msra.mxu1 %v2436_v22  ;;  %1306 = vmatprep.subr.bf16.mxu0 %v2441_v23  ;;  %v2471_v43 = vld [vmem:[#allocation6 + $0x4] ss:$16 sps:$4 sm:$0xff]   ;;  %v2469_v45 = vld [vmem:[#allocation6] ss:$16 sps:$4 sm:$0xff]  }
  0x46   :  { %1347 = vmatprep.subr.bf16.mxu1 %v2444_v24  ;;  %v2474_v44 = vld [vmem:[#allocation6 + $0x204] ss:$16 sps:$4 sm:$0xff]   ;;  %v2472_v46 = vld [vmem:[#allocation6 + $0x200] ss:$16 sps:$4 sm:$0xff]  }
  0x47   :  { %v2477_v50 = vld [vmem:[#allocation6 + $0x1e4] ss:$16 sps:$4 sm:$0xff]   ;;  %v2475_v52 = vld [vmem:[#allocation6 + $0x1e0] ss:$16 sps:$4 sm:$0xff]  }
  0x48   :  { %1307 = vmatpush1.bf16.msra.mxu0 %v2439_v25  ;;  %v2480_v51 = vld [vmem:[#allocation6 + $0x3e4] ss:$16 sps:$4 sm:$0xff]   ;;  %v2478_v53 = vld [vmem:[#allocation6 + $0x3e0] ss:$16 sps:$4 sm:$0xff]  }
  0x49   :  { %1348 = vmatpush1.bf16.msra.mxu1 %v2442_v26  ;;  %1308 = vmatprep.subr.bf16.mxu0 %v2447_v27  ;;  %v2483_v56 = vld [vmem:[#allocation6 + $0x1c4] ss:$16 sps:$4 sm:$0xff]   ;;  %v2481_v58 = vld [vmem:[#allocation6 + $0x1c0] ss:$16 sps:$4 sm:$0xff]  }
  0x4a   :  { %1349 = vmatprep.subr.bf16.mxu1 %v2450_v28  ;;  %v2486_v57 = vld [vmem:[#allocation6 + $0x3c4] ss:$16 sps:$4 sm:$0xff]   ;;  %v2484_v59 = vld [vmem:[#allocation6 + $0x3c0] ss:$16 sps:$4 sm:$0xff]  }
  0x4b   :  { %v2489_v61 = vld [vmem:[#allocation6 + $0x1a4] ss:$16 sps:$4 sm:$0xff]   ;;  %v2487_v0 = vld [vmem:[#allocation6 + $0x1a0] ss:$16 sps:$4 sm:$0xff]  }
  0x4c   :  { %1309 = vmatpush1.bf16.msra.mxu0 %v2445_v29  ;;  %v2492_v62 = vld [vmem:[#allocation6 + $0x3a4] ss:$16 sps:$4 sm:$0xff]   ;;  %v2490_v3 = vld [vmem:[#allocation6 + $0x3a0] ss:$16 sps:$4 sm:$0xff]  }
  0x4d   :  { %1350 = vmatpush1.bf16.msra.mxu1 %v2448_v30  ;;  %1310 = vmatprep.subr.bf16.mxu0 %v2453_v31  ;;  %v88_v63 = vld [vmem:[#allocation3] sm:$0xff]  ;;  %v2493_v8 = vld [vmem:[#allocation6 + $0x180] ss:$16 sps:$4 sm:$0xff]   ;;  %v2529_v30 = vld [vmem:[#allocation6 + $0xec] ss:$16 sps:$4 sm:$0xff]  }
  0x4e   :  { %1351 = vmatprep.subr.bf16.mxu1 %v2456_v32  ;;  %v99_v1 = vrot.slane %v88_v63, %v98_v60  ;;  %v92_v2 = vcombine.high %v88_v63, %v88_v63  ;;  %v2495_v4 = vld [vmem:[#allocation6 + $0x184] ss:$16 sps:$4 sm:$0xff]   ;;  %v2496_v11 = vld [vmem:[#allocation6 + $0x380] ss:$16 sps:$4 sm:$0xff]  }
  0x4f   :  { %v2498_v5 = vld [vmem:[#allocation6 + $0x384] ss:$16 sps:$4 sm:$0xff]   ;;  %v2499_v15 = vld [vmem:[#allocation6 + $0x160] ss:$16 sps:$4 sm:$0xff]  }
  0x50   :  { %1311 = vmatpush1.bf16.msra.mxu0 %v2451_v33  ;;  %v107_v6 = vcombine.high %v99_v1, %v99_v1  ;;  %v106_v7 = vrot.slane %v92_v2, %v98_v60  ;;  %v2501_v12 = vld [vmem:[#allocation6 + $0x164] ss:$16 sps:$4 sm:$0xff]   ;;  %v2502_v16 = vld [vmem:[#allocation6 + $0x360] ss:$16 sps:$4 sm:$0xff]   ;;  %v2978_v31 = vpack.c.bf16 %v99_v1, %v99_v1  ;;  %v2565_v60 = vld [vmem:[#allocation6 + $0x2c] ss:$16 sps:$4 sm:$0xff]  }
  0x51   :  { %1352 = vmatpush1.bf16.msra.mxu1 %v2454_v34  ;;  %1312 = vmatprep.subr.bf16.mxu0 %v2459_v35  ;;  %v2504_v13 = vld [vmem:[#allocation6 + $0x364] ss:$16 sps:$4 sm:$0xff]   ;;  %v2505_v19 = vld [vmem:[#allocation6 + $0x140] ss:$16 sps:$4 sm:$0xff]   ;;  %v2527_v34 = vld [vmem:[#allocation6 + $0xe8] ss:$16 sps:$4 sm:$0xff]  }
  0x52   :  { %1353 = vmatprep.subr.bf16.mxu1 %v2462_v36  ;;  %v2972_v9 = vpack.c.bf16 %v107_v6, %v107_v6  ;;  %v108_v10 = vcombine.high %v106_v7, %v106_v7  ;;  %v2507_v17 = vld [vmem:[#allocation6 + $0x144] ss:$16 sps:$4 sm:$0xff]   ;;  %v2508_v20 = vld [vmem:[#allocation6 + $0x340] ss:$16 sps:$4 sm:$0xff]   ;;  %v2980_v32 = vpack.c.bf16 %v106_v7, %v106_v7  ;;  %v2535_v36 = vld [vmem:[#allocation6 + $0xcc] ss:$16 sps:$4 sm:$0xff]  }
  0x53   :  { %v2510_v18 = vld [vmem:[#allocation6 + $0x344] ss:$16 sps:$4 sm:$0xff]   ;;  %v2511_v23 = vld [vmem:[#allocation6 + $0x120] ss:$16 sps:$4 sm:$0xff]   ;;  %v2573_v7 = vld [vmem:[#allocation6 + $0x1e8] ss:$16 sps:$4 sm:$0xff]  }
  0x54   :  { %1313 = vmatpush1.bf16.msra.mxu0 %v2457_v37  ;;  %v2974_v14 = vpack.c.bf16 %v108_v10, %v108_v10  ;;  %1334 = vmatprep.mubr.bf16.mxu0 %v2972_v9  ;;  %v2513_v21 = vld [vmem:[#allocation6 + $0x124] ss:$16 sps:$4 sm:$0xff]   ;;  %v2514_v24 = vld [vmem:[#allocation6 + $0x320] ss:$16 sps:$4 sm:$0xff]   ;;  %v2582_v10 = vld [vmem:[#allocation6 + $0x1cc] ss:$16 sps:$4 sm:$0xff]  }
  0x55   :  { %1354 = vmatpush1.bf16.msra.mxu1 %v2460_v38  ;;  %1314 = vmatprep.subr.bf16.mxu0 %v2465_v39  ;;  %v2516_v22 = vld [vmem:[#allocation6 + $0x324] ss:$16 sps:$4 sm:$0xff]   ;;  %v2517_v27 = vld [vmem:[#allocation6 + $0x100] ss:$16 sps:$4 sm:$0xff]   ;;  %v2533_v38 = vld [vmem:[#allocation6 + $0xc8] ss:$16 sps:$4 sm:$0xff]  }
  0x56   :  { %1355 = vmatprep.subr.bf16.mxu1 %v2468_v40  ;;  %1375 = vmatprep.mubr.bf16.mxu1 %v2974_v14  ;;  %v2519_v25 = vld [vmem:[#allocation6 + $0x104] ss:$16 sps:$4 sm:$0xff]   ;;  %v2520_v28 = vld [vmem:[#allocation6 + $0x300] ss:$16 sps:$4 sm:$0xff]  }
  0x57   :  { %v2522_v26 = vld [vmem:[#allocation6 + $0x304] ss:$16 sps:$4 sm:$0xff]   ;;  %v2524_v33 = vld [vmem:[#allocation6 + $0x4e0] ss:$16 sps:$4 sm:$0xff]  }
  0x58   :  { %1315 = vmatpush1.bf16.msra.mxu0 %v2463_v41  ;;  %v2526_v29 = vld [vmem:[#allocation6 + $0x4e4] ss:$16 sps:$4 sm:$0xff]   ;;  %v2530_v37 = vld [vmem:[#allocation6 + $0x4c0] ss:$16 sps:$4 sm:$0xff]  }
  0x59   :  { %1356 = vmatpush1.bf16.msra.mxu1 %v2466_v42  ;;  %1316 = vmatprep.subr.bf16.mxu0 %v2471_v43  ;;  %v2532_v35 = vld [vmem:[#allocation6 + $0x4c4] ss:$16 sps:$4 sm:$0xff]   ;;  %v2984_v39 = vld.sshfl [vmem:[#allocation3 + $0x8] sm:$0x33 pattern:$0x76325410] }
  0x5a   :  { %1357 = vmatprep.subr.bf16.mxu1 %v2474_v44  ;;  %v2538_v40 = vld [vmem:[#allocation6 + $0x4a4] ss:$16 sps:$4 sm:$0xff]   ;;  %v116_v41 = vcombine.high %v2984_v39, %v2984_v39  ;;  %v2541_v42 = vld [vmem:[#allocation6 + $0xac] ss:$16 sps:$4 sm:$0xff]   ;;  %v2536_v44 = vld [vmem:[#allocation6 + $0x4a0] ss:$16 sps:$4 sm:$0xff]  }
  0x5b   :  { %v2542_v48 = vld [vmem:[#allocation6 + $0x480] ss:$16 sps:$4 sm:$0xff]   ;;  %v2556_v54 = vld [vmem:[#allocation6 + $0x444] ss:$16 sps:$4 sm:$0xff]  }
  0x5c   :  { %1317 = vmatpush1.bf16.msra.mxu0 %v2469_v45  ;;  %v2988_v43 = vpack.c.bf16 %v116_v41, %v116_v41  ;;  %v2539_v45 = vld [vmem:[#allocation6 + $0xa8] ss:$16 sps:$4 sm:$0xff]   ;;  %v2568_v63 = vld [vmem:[#allocation6 + $0x404] ss:$16 sps:$4 sm:$0xff]   ;;  %v2566_v2 = vld [vmem:[#allocation6 + $0x400] ss:$16 sps:$4 sm:$0xff]  }
  0x5d   :  { %1358 = vmatpush1.bf16.msra.mxu1 %v2472_v46  ;;  %1318 = vmatprep.subr.bf16.mxu0 %v2477_v50  ;;  %v2544_v46 = vld [vmem:[#allocation6 + $0x484] ss:$16 sps:$4 sm:$0xff]   ;;  %v2621_v41 = vld [vmem:[#allocation6 + $0x24c] ss:$16 sps:$4 sm:$0xff]  }
  0x5e   :  { %1359 = vmatprep.subr.bf16.mxu1 %v2480_v51  ;;  %v2550_v50 = vld [vmem:[#allocation6 + $0x464] ss:$16 sps:$4 sm:$0xff]   ;;  %v2553_v51 = vld [vmem:[#allocation6 + $0x6c] ss:$16 sps:$4 sm:$0xff]  }
  0x5f   :  { %v299_v1 = vld [vmem:[#allocation6 + $0x540] sm:$0x77] }
  0x60   :  { %1319 = vmatpush2.bf16.msra.mxu0 %v2475_v52  ;;  %v2548_v52 = vld [vmem:[#allocation6 + $0x460] ss:$16 sps:$4 sm:$0xff]   ;;  %v2332_v6 = vcombine.low %v299_v1, %v299_v1 }
  0x61   :  { %1360 = vmatpush2.bf16.msra.mxu1 %v2478_v53  ;;  %1320 = vmatprep.subr.bf16.mxu0 %v2483_v56  ;;  %v2551_v53 = vld [vmem:[#allocation6 + $0x68] ss:$16 sps:$4 sm:$0xff]   ;;  %v2559_v56 = vld [vmem:[#allocation6 + $0x4c] ss:$16 sps:$4 sm:$0xff]  }
  0x62   :  { %1361 = vmatprep.subr.bf16.mxu1 %v2486_v57  ;;  %v2554_v57 = vld [vmem:[#allocation6 + $0x440] ss:$16 sps:$4 sm:$0xff]  }
  0x64   :  { %1321 = vmatpush2.bf16.msra.mxu0 %v2481_v58  ;;  %v2557_v58 = vld [vmem:[#allocation6 + $0x48] ss:$16 sps:$4 sm:$0xff]  }
  0x65   :  { %1362 = vmatpush2.bf16.msra.mxu1 %v2484_v59  ;;  %1322 = vmatprep.subr.bf16.mxu0 %v2489_v61  ;;  %v2562_v59 = vld [vmem:[#allocation6 + $0x424] ss:$16 sps:$4 sm:$0xff]   ;;  %v2560_v61 = vld [vmem:[#allocation6 + $0x420] ss:$16 sps:$4 sm:$0xff]  }
  0x66   :  { %1363 = vmatprep.subr.bf16.mxu1 %v2492_v62  ;;  %v2563_v62 = vld [vmem:[#allocation6 + $0x28] ss:$16 sps:$4 sm:$0xff]  }
  0x68   :  { %1323 = vmatpush2.bf16.msra.mxu0 %v2487_v0  ;;  %v2571_v0 = vld [vmem:[#allocation6 + $0xc] ss:$16 sps:$4 sm:$0xff]  }
  0x69   :  { %1364 = vmatpush2.bf16.msra.mxu1 %v2490_v3  ;;  %1324 = vmatprep.subr.bf16.mxu0 %v2495_v4  ;;  %v2569_v3 = vld [vmem:[#allocation6 + $0x8] ss:$16 sps:$4 sm:$0xff]   ;;  %v2333_v4 = vcombine.high %v299_v1, %v299_v1  ;;  %v2660_v1 = vld [vmem:[#allocation6 + $0x42c] ss:$16 sps:$4 sm:$0xff]  }
  0x6a   :  { %1365 = vmatprep.subr.bf16.mxu1 %v2498_v5  ;;  %v2575_v5 = vld [vmem:[#allocation6 + $0x1ec] ss:$16 sps:$4 sm:$0xff]  }
  0x6c   :  { %1325 = vmatpush2.bf16.msra.mxu0 %v2493_v8  ;;  %v2579_v8 = vld [vmem:[#allocation6 + $0x524] ss:$16 sps:$4 sm:$0xff]  }
  0x6d   :  { %1366 = vmatpush2.bf16.msra.mxu1 %v2496_v11  ;;  %1326 = vmatprep.subr.bf16.mxu0 %v2501_v12  ;;  %v2577_v11 = vld [vmem:[#allocation6 + $0x520] ss:$16 sps:$4 sm:$0xff]   ;;  %v2580_v12 = vld [vmem:[#allocation6 + $0x1c8] ss:$16 sps:$4 sm:$0xff]  }
  0x6e   :  { %1367 = vmatprep.subr.bf16.mxu1 %v2504_v13  ;;  %v2585_v13 = vld [vmem:[#allocation6 + $0x504] ss:$16 sps:$4 sm:$0xff]  }
  0x70   :  { %1327 = vmatpush2.bf16.msra.mxu0 %v2499_v15  ;;  %v2588_v15 = vld [vmem:[#allocation6 + $0x1ac] ss:$16 sps:$4 sm:$0xff]  }
  0x71   :  { %1368 = vmatpush2.bf16.msra.mxu1 %v2502_v16  ;;  %1328 = vmatprep.subr.bf16.mxu0 %v2507_v17  ;;  %v2583_v16 = vld [vmem:[#allocation6 + $0x500] ss:$16 sps:$4 sm:$0xff]   ;;  %v2586_v17 = vld [vmem:[#allocation6 + $0x1a8] ss:$16 sps:$4 sm:$0xff]  }
  0x72   :  { %1369 = vmatprep.subr.bf16.mxu1 %v2510_v18  ;;  %v2591_v18 = vld [vmem:[#allocation6 + $0x18c] ss:$16 sps:$4 sm:$0xff]  }
  0x74   :  { %1329 = vmatpush2.bf16.msra.mxu0 %v2505_v19  ;;  %v2594_v19 = vld [vmem:[#allocation6 + $0x2ec] ss:$16 sps:$4 sm:$0xff]  }
  0x75   :  { %1370 = vmatpush2.bf16.msra.mxu1 %v2508_v20  ;;  %1330 = vmatprep.subr.bf16.mxu0 %v2513_v21  ;;  %v2997_v20 = vpack.c.bf16 %v2984_v39, %v2984_v39  ;;  %v2589_v21 = vld [vmem:[#allocation6 + $0x188] ss:$16 sps:$4 sm:$0xff]  }
  0x76   :  { %1371 = vmatprep.subr.bf16.mxu1 %v2516_v22  ;;  %v2592_v22 = vld [vmem:[#allocation6 + $0x2e8] ss:$16 sps:$4 sm:$0xff]  }
  0x77   :  { %v2613_v39 = vld [vmem:[#allocation6 + $0x108] ss:$16 sps:$4 sm:$0xff]  }
  0x78   :  { %1331 = vmatpush2.bf16.msra.mxu0 %v2511_v23  ;;  %v2597_v23 = vld [vmem:[#allocation6 + $0x16c] ss:$16 sps:$4 sm:$0xff]  }
  0x79   :  { %1372 = vmatpush2.bf16.msra.mxu1 %v2514_v24  ;;  %1332 = vmatprep.subr.bf16.mxu0 %v2519_v25  ;;  %v2600_v24 = vld [vmem:[#allocation6 + $0x2cc] ss:$16 sps:$4 sm:$0xff]   ;;  %v2595_v25 = vld [vmem:[#allocation6 + $0x168] ss:$16 sps:$4 sm:$0xff]  }
  0x7a   :  { %1373 = vmatprep.subr.bf16.mxu1 %v2522_v26  ;;  %v2598_v26 = vld [vmem:[#allocation6 + $0x2c8] ss:$16 sps:$4 sm:$0xff]  }
  0x7c   :  { %1333 = vmatpush2.bf16.msra.mxu0 %v2517_v27  ;;  %v2603_v27 = vld [vmem:[#allocation6 + $0x14c] ss:$16 sps:$4 sm:$0xff]  }
  0x7d   :  { %1374 = vmatpush2.bf16.msra.mxu1 %v2520_v28  ;;  %1384 = vmatprep.subr.bf16.mxu0 %v2526_v29  ;;  %v2606_v28 = vld [vmem:[#allocation6 + $0x2ac] ss:$16 sps:$4 sm:$0xff]   ;;  %v2601_v29 = vld [vmem:[#allocation6 + $0x148] ss:$16 sps:$4 sm:$0xff]  }
  0x7e   :  { %1425 = vmatprep.subr.bf16.mxu1 %v2529_v30  ;;  %v2604_v30 = vld [vmem:[#allocation6 + $0x2a8] ss:$16 sps:$4 sm:$0xff]  }
  0x7f   :  { %1335 = vmatmul.mubr.bf16.vlgmr.msra.gmra.mxu0 %v2978_v31 }
  0x80   :  { %1376 = vmatmul.mubr.bf16.vlgmr.msra.gmra.mxu1 %v2980_v32  ;;  %1385 = vmatpush1.bf16.msra.mxu0 %v2524_v33  ;;  %v2609_v33 = vld [vmem:[#allocation6 + $0x12c] ss:$16 sps:$4 sm:$0xff]  }
  0x81   :  { %1426 = vmatpush1.bf16.msra.mxu1 %v2527_v34  ;;  %1386 = vmatprep.subr.bf16.mxu0 %v2532_v35  ;;  %v2612_v34 = vld [vmem:[#allocation6 + $0x28c] ss:$16 sps:$4 sm:$0xff]   ;;  %v2607_v35 = vld [vmem:[#allocation6 + $0x128] ss:$16 sps:$4 sm:$0xff]  }
  0x82   :  { %1427 = vmatprep.subr.bf16.mxu1 %v2535_v36  ;;  %1457 = vmatprep.mubr.bf16.mxu1 %v2972_v9  ;;  %v1291_v9 = vsel %vm341_vm0, %v2332_v6, 0  ;;  %v2610_v36 = vld [vmem:[#allocation6 + $0x288] ss:$16 sps:$4 sm:$0xff]  }
  0x83   :  { %2337 = vmatprep.mubr.msk.bf16.mxu0 %vm1286_vm2, %v2988_v43  ;;  %v300_v6 = vld [vmem:[#allocation6 + $0x548] sm:$0x77] }
  0x84   :  { %1387 = vmatpush1.bf16.msra.mxu0 %v2530_v37  ;;  %v2615_v37 = vld [vmem:[#allocation6 + $0x10c] ss:$16 sps:$4 sm:$0xff]  }
  0x85   :  { %1428 = vmatpush1.bf16.msra.mxu1 %v2533_v38  ;;  %1388 = vmatprep.subr.bf16.mxu0 %v2538_v40  ;;  %v2618_v38 = vld [vmem:[#allocation6 + $0x26c] ss:$16 sps:$4 sm:$0xff]   ;;  %v2616_v40 = vld [vmem:[#allocation6 + $0x268] ss:$16 sps:$4 sm:$0xff]  }
  0x86   :  { %1429 = vmatprep.subr.bf16.mxu1 %v2541_v42  ;;  %v2624_v42 = vld [vmem:[#allocation6 + $0x4ec] ss:$16 sps:$4 sm:$0xff]  }
  0x88   :  { %1389 = vmatpush1.bf16.msra.mxu0 %v2536_v44  ;;  %v2622_v44 = vld [vmem:[#allocation6 + $0x4e8] ss:$16 sps:$4 sm:$0xff]  }
  0x89   :  { %1430 = vmatpush1.bf16.msra.mxu1 %v2539_v45  ;;  %1390 = vmatprep.subr.bf16.mxu0 %v2544_v46  ;;  %v2627_v45 = vld [vmem:[#allocation6 + $0x22c] ss:$16 sps:$4 sm:$0xff]  }
  0x8a   :  { %1431 = vmatprep.subr.bf16.mxu1 %v2547_v47  ;;  %v2630_v46 = vld [vmem:[#allocation6 + $0x4cc] ss:$16 sps:$4 sm:$0xff]   ;;  %v2625_v47 = vld [vmem:[#allocation6 + $0x228] ss:$16 sps:$4 sm:$0xff]  }
  0x8c   :  { %1391 = vmatpush1.bf16.msra.mxu0 %v2542_v48  ;;  %v2628_v48 = vld [vmem:[#allocation6 + $0x4c8] ss:$16 sps:$4 sm:$0xff]  }
  0x8d   :  { %1432 = vmatpush1.bf16.msra.mxu1 %v2545_v49  ;;  %1392 = vmatprep.subr.bf16.mxu0 %v2550_v50  ;;  %v2633_v49 = vld [vmem:[#allocation6 + $0x20c] ss:$16 sps:$4 sm:$0xff]  }
  0x8e   :  { %1433 = vmatprep.subr.bf16.mxu1 %v2553_v51  ;;  %v2636_v50 = vld [vmem:[#allocation6 + $0x4ac] ss:$16 sps:$4 sm:$0xff]   ;;  %v2631_v51 = vld [vmem:[#allocation6 + $0x208] ss:$16 sps:$4 sm:$0xff]  }
  0x90   :  { %1393 = vmatpush1.bf16.msra.mxu0 %v2548_v52  ;;  %v2634_v52 = vld [vmem:[#allocation6 + $0x4a8] ss:$16 sps:$4 sm:$0xff]  }
  0x91   :  { %1434 = vmatpush1.bf16.msra.mxu1 %v2551_v53  ;;  %1394 = vmatprep.subr.bf16.mxu0 %v2556_v54  ;;  %v2639_v53 = vld [vmem:[#allocation6 + $0x3ec] ss:$16 sps:$4 sm:$0xff]  }
  0x92   :  { %1435 = vmatprep.subr.bf16.mxu1 %v2559_v56  ;;  %v2642_v54 = vld [vmem:[#allocation6 + $0x48c] ss:$16 sps:$4 sm:$0xff]   ;;  %v2640_v56 = vld [vmem:[#allocation6 + $0x488] ss:$16 sps:$4 sm:$0xff]  }
  0x94   :  { %1395 = vmatpush1.bf16.msra.mxu0 %v2554_v57  ;;  %v2645_v57 = vld [vmem:[#allocation6 + $0x3cc] ss:$16 sps:$4 sm:$0xff]  }
  0x95   :  { %1436 = vmatpush1.bf16.msra.mxu1 %v2557_v58  ;;  %1396 = vmatprep.subr.bf16.mxu0 %v2562_v59  ;;  %v2648_v58 = vld [vmem:[#allocation6 + $0x46c] ss:$16 sps:$4 sm:$0xff]   ;;  %v2643_v59 = vld [vmem:[#allocation6 + $0x3c8] ss:$16 sps:$4 sm:$0xff]  }
  0x96   :  { %1437 = vmatprep.subr.bf16.mxu1 %v2565_v60  ;;  %v2651_v60 = vld [vmem:[#allocation6 + $0x3ac] ss:$16 sps:$4 sm:$0xff]  }
  0x98   :  { %1397 = vmatpush1.bf16.msra.mxu0 %v2560_v61  ;;  %v2654_v61 = vld [vmem:[#allocation6 + $0x44c] ss:$16 sps:$4 sm:$0xff]  }
  0x99   :  { %1438 = vmatpush1.bf16.msra.mxu1 %v2563_v62  ;;  %1398 = vmatprep.subr.bf16.mxu0 %v2568_v63  ;;  %v2649_v62 = vld [vmem:[#allocation6 + $0x3a8] ss:$16 sps:$4 sm:$0xff]  }
  0x9a   :  { %1439 = vmatprep.subr.bf16.mxu1 %v2571_v0  ;;  %v2652_v63 = vld [vmem:[#allocation6 + $0x448] ss:$16 sps:$4 sm:$0xff]   ;;  %v2657_v0 = vld [vmem:[#allocation6 + $0x38c] ss:$16 sps:$4 sm:$0xff]  }
  0x9c   :  { %1399 = vmatpush1.bf16.msra.mxu0 %v2566_v2  ;;  %v2655_v2 = vld [vmem:[#allocation6 + $0x388] ss:$16 sps:$4 sm:$0xff]  }
  0x9d   :  { %1440 = vmatpush1.bf16.msra.mxu1 %v2569_v3  ;;  %2336 = vmatprep.subr.msk.bf16.mxu0 %vm341_vm0, %v2333_v4  ;;  %v2658_v3 = vld [vmem:[#allocation6 + $0x428] ss:$16 sps:$4 sm:$0xff]   ;;  %v2663_v4 = vld [vmem:[#allocation6 + $0x36c] ss:$16 sps:$4 sm:$0xff]  }
  0x9e   :  { %1441 = vmatprep.subr.bf16.mxu1 %v2575_v5  ;;  %v2666_v5 = vld [vmem:[#allocation6 + $0x40c] ss:$16 sps:$4 sm:$0xff]  }
  0xa0   :  { %1411 = vmatpush2.bf16.msra.mxu0 %v1291_v9  ;;  %v2669_v9 = vld [vmem:[#allocation6 + $0x34c] ss:$16 sps:$4 sm:$0xff]  }
  0xa1   :  { %1442 = vmatpush2.bf16.msra.mxu1 %v2573_v7  ;;  %1412 = vmatprep.subr.bf16.mxu0 %v2579_v8  ;;  %v2661_v7 = vld [vmem:[#allocation6 + $0x368] ss:$16 sps:$4 sm:$0xff]  }
  0xa2   :  { %1443 = vmatprep.subr.bf16.mxu1 %v2582_v10  ;;  %v2664_v8 = vld [vmem:[#allocation6 + $0x408] ss:$16 sps:$4 sm:$0xff]   ;;  %v2335_v10 = vcombine.high %v300_v6, %v300_v6 }
  0xa4   :  { %1413 = vmatpush2.bf16.msra.mxu0 %v2577_v11  ;;  %v2334_v11 = vcombine.low %v300_v6, %v300_v6  ;;  %v2758_v6 = vld [vmem:[#allocation9 + $0x1f4] ss:$8 sps:$4 sm:$0xff]  }
  0xa5   :  { %1444 = vmatpush2.bf16.msra.mxu1 %v2580_v12  ;;  %1414 = vmatprep.subr.bf16.mxu0 %v2585_v13  ;;  %v2667_v12 = vld [vmem:[#allocation6 + $0x348] ss:$16 sps:$4 sm:$0xff]  }
  0xa6   :  { %1445 = vmatprep.subr.bf16.mxu1 %v2588_v15  ;;  %v1297_v13 = vsel %vm341_vm0, %v2334_v11, 0  ;;  %v2674_v15 = vld [vmem:[#allocation6 + $0x32c] ss:$16 sps:$4 sm:$0xff]   ;;  %v2720_v11 = vld [vmem:[#allocation9 + $0xb0] ss:$8 sps:$4 sm:$0xff]  }
  0xa8   :  { %1415 = vmatpush2.bf16.msra.mxu0 %v2583_v16  ;;  %v2677_v16 = vld [vmem:[#allocation6 + $0x52c] ss:$16 sps:$4 sm:$0xff]  }
  0xa9   :  { %1446 = vmatpush2.bf16.msra.mxu1 %v2586_v17  ;;  %1466 = vmatprep.subr.bf16.mxu0 %v2594_v19  ;;  %v2672_v17 = vld [vmem:[#allocation6 + $0x328] ss:$16 sps:$4 sm:$0xff]   ;;  %v2680_v19 = vld [vmem:[#allocation6 + $0x30c] ss:$16 sps:$4 sm:$0xff]  }
  0xaa   :  { %1447 = vmatprep.subr.bf16.mxu1 %v2591_v18  ;;  %v2675_v18 = vld [vmem:[#allocation6 + $0x528] ss:$16 sps:$4 sm:$0xff]  }
  0xab   :  { %1417 = vmatmul.mubr.bf16.vlgmr.msra.gmra.mxu0 %v2997_v20 }
  0xac   :  { %1467 = vmatpush1.bf16.msra.mxu0 %v2592_v22  ;;  %1498 = vmatprep.mubr.bf16.mxu0 %v2974_v14  ;;  %v2619_v14 = vld [vmem:[#allocation6 + $0x248] ss:$16 sps:$4 sm:$0xff]  }
  0xad   :  { %1448 = vmatpush2.bf16.msra.mxu1 %v2589_v21  ;;  %1468 = vmatprep.subr.bf16.mxu0 %v2600_v24  ;;  %v2683_v21 = vld [vmem:[#allocation6 + $0x50c] ss:$16 sps:$4 sm:$0xff]   ;;  %v2678_v22 = vld [vmem:[#allocation6 + $0x308] ss:$16 sps:$4 sm:$0xff]  }
  0xae   :  { %1449 = vmatprep.subr.bf16.mxu1 %v2597_v23  ;;  %v2681_v23 = vld [vmem:[#allocation6 + $0x508] ss:$16 sps:$4 sm:$0xff]   ;;  %v2686_v24 = vld [vmem:[#allocation9 + $0x74] ss:$8 sps:$4 sm:$0xff]  }
  0xb0   :  { %1469 = vmatpush1.bf16.msra.mxu0 %v2598_v26  ;;  %v2689_v26 = vld [vmem:[#allocation9 + $0x64] ss:$8 sps:$4 sm:$0xff]  }
  0xb1   :  { %1450 = vmatpush2.bf16.msra.mxu1 %v2595_v25  ;;  %1470 = vmatprep.subr.bf16.mxu0 %v2606_v28  ;;  %v2684_v25 = vld [vmem:[#allocation9 + $0x70] ss:$8 sps:$4 sm:$0xff]   ;;  %v2692_v28 = vld [vmem:[#allocation9 + $0x54] ss:$8 sps:$4 sm:$0xff]  }
  0xb2   :  { %1451 = vmatprep.subr.bf16.mxu1 %v2603_v27  ;;  %v2687_v27 = vld [vmem:[#allocation9 + $0x60] ss:$8 sps:$4 sm:$0xff]  }
  0xb4   :  { %1471 = vmatpush1.bf16.msra.mxu0 %v2604_v30  ;;  %v2695_v30 = vld [vmem:[#allocation9 + $0x44] ss:$8 sps:$4 sm:$0xff]  }
  0xb5   :  { %1452 = vmatpush2.bf16.msra.mxu1 %v2601_v29  ;;  %1472 = vmatprep.subr.bf16.mxu0 %v2612_v34  ;;  %v2690_v29 = vld [vmem:[#allocation9 + $0x50] ss:$8 sps:$4 sm:$0xff]   ;;  %v2698_v34 = vld [vmem:[#allocation9 + $0x34] ss:$8 sps:$4 sm:$0xff]  }
  0xb6   :  { %1453 = vmatprep.subr.bf16.mxu1 %v2609_v33  ;;  %v2693_v33 = vld [vmem:[#allocation9 + $0x40] ss:$8 sps:$4 sm:$0xff]  }
  0xb8   :  { %1473 = vmatpush1.bf16.msra.mxu0 %v2610_v36  ;;  %v2734_v36 = vld [vmem:[#allocation9 + $0x174] ss:$8 sps:$4 sm:$0xff]  }
  0xb9   :  { %1454 = vmatpush2.bf16.msra.mxu1 %v2607_v35  ;;  %1474 = vmatprep.subr.bf16.mxu0 %v2618_v38  ;;  %v2732_v35 = vld [vmem:[#allocation9 + $0x170] ss:$8 sps:$4 sm:$0xff]   ;;  %v2737_v38 = vld [vmem:[#allocation9 + $0x164] ss:$8 sps:$4 sm:$0xff]  }
  0xba   :  { %1455 = vmatprep.subr.bf16.mxu1 %v2615_v37  ;;  %v2696_v37 = vld [vmem:[#allocation9 + $0x30] ss:$8 sps:$4 sm:$0xff]  }
  0xbc   :  { %1475 = vmatpush1.bf16.msra.mxu0 %v2616_v40  ;;  %v2704_v40 = vld [vmem:[#allocation9 + $0x14] ss:$8 sps:$4 sm:$0xff]  }
  0xbd   :  { %1456 = vmatpush2.bf16.msra.mxu1 %v2613_v39  ;;  %1476 = vmatprep.subr.bf16.mxu0 %v2621_v41  ;;  %v2699_v39 = vld [vmem:[#allocation9 + $0x20] ss:$8 sps:$4 sm:$0xff]  }
  0xbe   :  { %1507 = vmatprep.subr.bf16.mxu1 %v2624_v42 }
  0xc0   :  { %1458 = vmatmul.mubr.bf16.vlgmr.msra.gmra.mxu1 %v2978_v31  ;;  %1477 = vmatpush1.bf16.msra.mxu0 %v2619_v14  ;;  %v2637_v31 = vld [vmem:[#allocation6 + $0x3e8] ss:$16 sps:$4 sm:$0xff]   ;;  %v2740_v14 = vld [vmem:[#allocation9 + $0x154] ss:$8 sps:$4 sm:$0xff]  }
  0xc1   :  { %1508 = vmatpush1.bf16.msra.mxu1 %v2622_v44  ;;  %1478 = vmatprep.subr.bf16.mxu0 %v2627_v45  ;;  %v2702_v44 = vld [vmem:[#allocation9 + $0x10] ss:$8 sps:$4 sm:$0xff]  }
  0xc2   :  { %1509 = vmatprep.subr.bf16.mxu1 %v2630_v46  ;;  %2339 = vmatprep.mubr.msk.bf16.mxu1 %vm1286_vm2, %v2988_v43  ;;  %v2646_v43 = vld [vmem:[#allocation6 + $0x468] ss:$16 sps:$4 sm:$0xff]  }
  0xc3   :  { %v2738_v45 = vld [vmem:[#allocation9 + $0x150] ss:$8 sps:$4 sm:$0xff]  }
  0xc4   :  { %1479 = vmatpush1.bf16.msra.mxu0 %v2625_v47 }
  0xc5   :  { %1510 = vmatpush1.bf16.msra.mxu1 %v2628_v48  ;;  %1480 = vmatprep.subr.bf16.mxu0 %v2633_v49  ;;  %v2707_v48 = vld [vmem:[#allocation9 + $0x4] ss:$8 sps:$4 sm:$0xff]  }
  0xc6   :  { %1511 = vmatprep.subr.bf16.mxu1 %v2636_v50 }
  0xc8   :  { %1481 = vmatpush1.bf16.msra.mxu0 %v2631_v51  ;;  %v2743_v51 = vld [vmem:[#allocation9 + $0x144] ss:$8 sps:$4 sm:$0xff]  }
  0xc9   :  { %1512 = vmatpush1.bf16.msra.mxu1 %v2634_v52  ;;  %1482 = vmatprep.subr.bf16.mxu0 %v2639_v53  ;;  %v2705_v52 = vld [vmem:[#allocation9] ss:$8 sps:$4 sm:$0xff]  }
  0xca   :  { %1513 = vmatprep.subr.bf16.mxu1 %v2642_v54  ;;  %v2741_v53 = vld [vmem:[#allocation9 + $0x140] ss:$8 sps:$4 sm:$0xff]  }
  0xcc   :  { %1483 = vmatpush2.bf16.msra.mxu0 %v2637_v31 }
  0xcd   :  { %1514 = vmatpush1.bf16.msra.mxu1 %v2640_v56  ;;  %1484 = vmatprep.subr.bf16.mxu0 %v2645_v57  ;;  %v2710_v56 = vld [vmem:[#allocation9 + $0xf4] ss:$8 sps:$4 sm:$0xff]  }
  0xce   :  { %1515 = vmatprep.subr.bf16.mxu1 %v2648_v58  ;;  %v2746_v57 = vld [vmem:[#allocation9 + $0x134] ss:$8 sps:$4 sm:$0xff]   ;;  %v2744_v58 = vld [vmem:[#allocation9 + $0x130] ss:$8 sps:$4 sm:$0xff]  }
  0xd0   :  { %1485 = vmatpush2.bf16.msra.mxu0 %v2643_v59  ;;  %v2749_v59 = vld [vmem:[#allocation9 + $0x124] ss:$8 sps:$4 sm:$0xff]  }
  0xd1   :  { %1516 = vmatpush1.bf16.msra.mxu1 %v2646_v43  ;;  %1486 = vmatprep.subr.bf16.mxu0 %v2651_v60  ;;  %v2708_v43 = vld [vmem:[#allocation9 + $0xf0] ss:$8 sps:$4 sm:$0xff]   ;;  %v2713_v60 = vld [vmem:[#allocation9 + $0xe4] ss:$8 sps:$4 sm:$0xff]  }
  0xd2   :  { %1517 = vmatprep.subr.bf16.mxu1 %v2654_v61  ;;  %v2747_v61 = vld [vmem:[#allocation9 + $0x120] ss:$8 sps:$4 sm:$0xff]  }
  0xd4   :  { %1487 = vmatpush2.bf16.msra.mxu0 %v2649_v62  ;;  %v2752_v62 = vld [vmem:[#allocation9 + $0x114] ss:$8 sps:$4 sm:$0xff]  }
  0xd5   :  { %1518 = vmatpush1.bf16.msra.mxu1 %v2652_v63  ;;  %1488 = vmatprep.subr.bf16.mxu0 %v2657_v0  ;;  %v2711_v63 = vld [vmem:[#allocation9 + $0xe0] ss:$8 sps:$4 sm:$0xff]   ;;  %v2716_v0 = vld [vmem:[#allocation9 + $0xd4] ss:$8 sps:$4 sm:$0xff]  }
  0xd6   :  { %1519 = vmatprep.subr.bf16.mxu1 %v2660_v1  ;;  %v2750_v1 = vld [vmem:[#allocation9 + $0x110] ss:$8 sps:$4 sm:$0xff]  }
  0xd8   :  { %1489 = vmatpush2.bf16.msra.mxu0 %v2655_v2  ;;  %v2755_v2 = vld [vmem:[#allocation9 + $0x104] ss:$8 sps:$4 sm:$0xff]  }
  0xd9   :  { %1520 = vmatpush1.bf16.msra.mxu1 %v2658_v3  ;;  %1490 = vmatprep.subr.bf16.mxu0 %v2663_v4  ;;  %v2714_v3 = vld [vmem:[#allocation9 + $0xd0] ss:$8 sps:$4 sm:$0xff]   ;;  %v2719_v4 = vld [vmem:[#allocation9 + $0xc4] ss:$8 sps:$4 sm:$0xff]  }
  0xda   :  { %1521 = vmatprep.subr.bf16.mxu1 %v2666_v5  ;;  %v2753_v5 = vld [vmem:[#allocation9 + $0x100] ss:$8 sps:$4 sm:$0xff]  }
  0xdc   :  { %1491 = vmatpush2.bf16.msra.mxu0 %v2661_v7  ;;  %v2717_v7 = vld [vmem:[#allocation9 + $0xc0] ss:$8 sps:$4 sm:$0xff]  }
  0xdd   :  { %1522 = vmatpush1.bf16.msra.mxu1 %v2664_v8  ;;  %1492 = vmatprep.subr.bf16.mxu0 %v2669_v9  ;;  %v2722_v8 = vld [vmem:[#allocation9 + $0xb4] ss:$8 sps:$4 sm:$0xff]   ;;  %v2756_v9 = vld [vmem:[#allocation9 + $0x1f0] ss:$8 sps:$4 sm:$0xff]  }
  0xde   :  { %2338 = vmatprep.subr.msk.bf16.mxu1 %vm341_vm0, %v2335_v10  ;;  %v2761_v10 = vld [vmem:[#allocation9 + $0x1e4] ss:$8 sps:$4 sm:$0xff]  }
  0xe0   :  { %1493 = vmatpush2.bf16.msra.mxu0 %v2667_v12  ;;  %v2725_v12 = vld [vmem:[#allocation9 + $0xa4] ss:$8 sps:$4 sm:$0xff]  }
  0xe1   :  { %1534 = vmatpush2.bf16.msra.mxu1 %v1297_v13  ;;  %1494 = vmatprep.subr.bf16.mxu0 %v2674_v15  ;;  %v2759_v13 = vld [vmem:[#allocation9 + $0x1e0] ss:$8 sps:$4 sm:$0xff]   ;;  %v2764_v15 = vld [vmem:[#allocation9 + $0x1d4] ss:$8 sps:$4 sm:$0xff]  }
  0xe2   :  { %1535 = vmatprep.subr.bf16.mxu1 %v2677_v16  ;;  %v2723_v16 = vld [vmem:[#allocation9 + $0xa0] ss:$8 sps:$4 sm:$0xff]  }
  0xe4   :  { %1495 = vmatpush2.bf16.msra.mxu0 %v2672_v17  ;;  %v2728_v17 = vld [vmem:[#allocation9 + $0x94] ss:$8 sps:$4 sm:$0xff]  }
  0xe5   :  { %1536 = vmatpush2.bf16.msra.mxu1 %v2675_v18  ;;  %1496 = vmatprep.subr.bf16.mxu0 %v2680_v19  ;;  %v2762_v18 = vld [vmem:[#allocation9 + $0x1d0] ss:$8 sps:$4 sm:$0xff]   ;;  %v2767_v19 = vld [vmem:[#allocation9 + $0x1c4] ss:$8 sps:$4 sm:$0xff]  }
  0xe6   :  { %1537 = vmatprep.subr.bf16.mxu1 %v2683_v21  ;;  %v2726_v21 = vld [vmem:[#allocation9 + $0x90] ss:$8 sps:$4 sm:$0xff]  }
  0xe8   :  { %1497 = vmatpush2.bf16.msra.mxu0 %v2678_v22  ;;  %v2731_v22 = vld [vmem:[#allocation9 + $0x84] ss:$8 sps:$4 sm:$0xff]  }
  0xe9   :  { %1538 = vmatpush2.bf16.msra.mxu1 %v2681_v23  ;;  %1978 = vmatprep.subr.bf16.mxu0 %v2686_v24  ;;  %v2765_v23 = vld [vmem:[#allocation9 + $0x1c0] ss:$8 sps:$4 sm:$0xff]   ;;  %v2770_v24 = vld [vmem:[#allocation9 + $0x1b4] ss:$8 sps:$4 sm:$0xff]  }
  0xea   :  { %2019 = vmatprep.subr.bf16.mxu1 %v2734_v36 }
  0xeb   :  { %1499 = vmatmul.mubr.bf16.vlgmr.msra.gmra.mxu0 %v2980_v32  ;;  %v2701_v32 = vld [vmem:[#allocation9 + $0x24] ss:$8 sps:$4 sm:$0xff]  }
  0xec   :  { %1540 = vmatmul.mubr.bf16.vlgmr.msra.gmra.mxu1 %v2997_v20  ;;  %1979 = vmatpush1.bf16.msra.mxu0 %v2684_v25  ;;  %v2735_v20 = vld [vmem:[#allocation9 + $0x160] ss:$8 sps:$4 sm:$0xff]  }
  0xed   :  { %1980 = vmatprep.subr.bf16.mxu0 %v2689_v26  ;;  %2020 = vmatpush1.bf16.msra.mxu1 %v2732_v35  ;;  %v2729_v25 = vld [vmem:[#allocation9 + $0x80] ss:$8 sps:$4 sm:$0xff]   ;;  %v2768_v26 = vld [vmem:[#allocation9 + $0x1b0] ss:$8 sps:$4 sm:$0xff]  }
  0xee   :  { %2021 = vmatprep.subr.bf16.mxu1 %v2737_v38 }
  0xf0   :  { %1981 = vmatpush1.bf16.msra.mxu0 %v2687_v27  ;;  %v2773_v27 = vld [vmem:[#allocation9 + $0x1a4] ss:$8 sps:$4 sm:$0xff]  }
  0xf1   :  { %1982 = vmatprep.subr.bf16.mxu0 %v2692_v28  ;;  %2022 = vmatpush1.bf16.msra.mxu1 %v2735_v20  ;;  %v2771_v28 = vld [vmem:[#allocation9 + $0x1a0] ss:$8 sps:$4 sm:$0xff]  }
  0xf2   :  { %2023 = vmatprep.subr.bf16.mxu1 %v2740_v14 }
  0xf4   :  { %1983 = vmatpush1.bf16.msra.mxu0 %v2690_v29  ;;  %v2776_v29 = vld [vmem:[#allocation9 + $0x194] ss:$8 sps:$4 sm:$0xff]  }
  0xf5   :  { %1984 = vmatprep.subr.bf16.mxu0 %v2695_v30  ;;  %2024 = vmatpush1.bf16.msra.mxu1 %v2738_v45  ;;  %v2774_v30 = vld [vmem:[#allocation9 + $0x190] ss:$8 sps:$4 sm:$0xff]   ;;  %v1548_v45 = vld [vmem:[%s3052_s4] sm:$0xf] }
  0xf6   :  { %2025 = vmatprep.subr.bf16.mxu1 %v2743_v51 }
  0xf8   :  { %1985 = vmatpush1.bf16.msra.mxu0 %v2693_v33  ;;  %v2779_v33 = vld [vmem:[#allocation9 + $0x184] ss:$8 sps:$4 sm:$0xff]  }
  0xf9   :  { %1986 = vmatprep.subr.bf16.mxu0 %v2698_v34  ;;  %2026 = vmatpush1.bf16.msra.mxu1 %v2741_v53  ;;  %v2777_v34 = vld [vmem:[#allocation9 + $0x180] ss:$8 sps:$4 sm:$0xff]  }
  0xfa   :  { %2027 = vmatprep.subr.bf16.mxu1 %v2746_v57 }
  0xfc   :  { %1987 = vmatpush1.bf16.msra.mxu0 %v2696_v37 }
  0xfd   :  { %1988 = vmatprep.subr.bf16.mxu0 %v2701_v32  ;;  %2028 = vmatpush1.bf16.msra.mxu1 %v2744_v58 }
  0xfe   :  { %2029 = vmatprep.subr.bf16.mxu1 %v2749_v59 }
  0xff   :  { %v3008_v41 = vpop.f32.mrf.mxu0 }
 0x100   :  { %v3010_v42 = vpop.f32.mrf.mxu1  ;;  %1989 = vmatpush1.bf16.msra.mxu0 %v2699_v39 }
 0x101   :  { %v3012_v46 = vpop.f32.mrf.mxu0  ;;  %1990 = vmatprep.subr.bf16.mxu0 %v2704_v40  ;;  %2030 = vmatpush1.bf16.msra.mxu1 %v2747_v61 }
 0x102   :  { %v3014_v47 = vpop.f32.mrf.mxu1  ;;  %2031 = vmatprep.subr.bf16.mxu1 %v2752_v62 }
 0x103   :  { %v392_v49 = vpop.f32.mrf.mxu0 }
 0x104   :  { %v433_v50 = vpop.f32.mrf.mxu1  ;;  %1991 = vmatpush1.bf16.msra.mxu0 %v2702_v44  ;;  %v1552_v44 = vsub.s32 0, %v2969_v55  ;;  %v1556_v49 = vsub.s32 1, %v2969_v55 }
 0x105   :  { %v393_v54 = vpop.f32.mrf.mxu0  ;;  %1992 = vmatprep.subr.bf16.mxu0 %v2707_v48  ;;  %2032 = vmatpush1.bf16.msra.mxu1 %v2750_v1 }
 0x106   :  { %v434_v31 = vpop.f32.mrf.mxu1  ;;  %2033 = vmatprep.subr.bf16.mxu1 %v2755_v2  ;;  %v1553_v51 = vrot.slane %v1548_v45, %v1552_v44 }
 0x108   :  { %1993 = vmatpush1.bf16.msra.mxu0 %v2705_v52 }
 0x109   :  { %1994 = vmatprep.subr.bf16.mxu0 %v2710_v56  ;;  %2034 = vmatpush1.bf16.msra.mxu1 %v2753_v5  ;;  %v1564_v5 = vsub.s32 3, %v2969_v55 }
 0x10a   :  { %2035 = vmatprep.subr.bf16.mxu1 %v2758_v6 }
 0x10c   :  { %1995 = vmatpush2.bf16.msra.mxu0 %v2708_v43 }
 0x10d   :  { %1996 = vmatprep.subr.bf16.mxu0 %v2713_v60  ;;  %2036 = vmatpush2.bf16.msra.mxu1 %v2756_v9 }
 0x10e   :  { %2037 = vmatprep.subr.bf16.mxu1 %v2761_v10 }
 0x110   :  { %1997 = vmatpush2.bf16.msra.mxu0 %v2711_v63 }
 0x111   :  { %1998 = vmatprep.subr.bf16.mxu0 %v2716_v0  ;;  %2038 = vmatpush2.bf16.msra.mxu1 %v2759_v13 }
 0x112   :  { %2039 = vmatprep.subr.bf16.mxu1 %v2764_v15 }
 0x114   :  { %1999 = vmatpush2.bf16.msra.mxu0 %v2714_v3  ;;  %v1560_v3 = vsub.s32 2, %v2969_v55 }
 0x115   :  { %2000 = vmatprep.subr.bf16.mxu0 %v2719_v4  ;;  %2040 = vmatpush2.bf16.msra.mxu1 %v2762_v18 }
 0x116   :  { %2041 = vmatprep.subr.bf16.mxu1 %v2767_v19  ;;  %v1561_v10 = vrot.slane %v1548_v45, %v1560_v3 }
 0x118   :  { %2001 = vmatpush2.bf16.msra.mxu0 %v2717_v7 }
 0x119   :  { %2002 = vmatprep.subr.bf16.mxu0 %v2722_v8  ;;  %2042 = vmatpush2.bf16.msra.mxu1 %v2765_v23 }
 0x11a   :  { %2043 = vmatprep.subr.bf16.mxu1 %v2770_v24 }
 0x11c   :  { %2003 = vmatpush2.bf16.msra.mxu0 %v2720_v11 }
 0x11d   :  { %2004 = vmatprep.subr.bf16.mxu0 %v2725_v12  ;;  %2044 = vmatpush2.bf16.msra.mxu1 %v2768_v26 }
 0x11e   :  { %2045 = vmatprep.subr.bf16.mxu1 %v2773_v27 }
 0x120   :  { %2005 = vmatpush2.bf16.msra.mxu0 %v2723_v16  ;;  %v1565_v16 = vrot.slane %v1548_v45, %v1564_v5 }
 0x121   :  { %2006 = vmatprep.subr.bf16.mxu0 %v2728_v17  ;;  %2046 = vmatpush2.bf16.msra.mxu1 %v2771_v28 }
 0x122   :  { %2047 = vmatprep.subr.bf16.mxu1 %v2776_v29  ;;  %v2404_v29 = vld.sshfl [vmem:[%s3055_s7] sm:$0x11 pattern:$0x75316420] }
 0x124   :  { %2007 = vmatpush2.bf16.msra.mxu0 %v2726_v21 }
 0x125   :  { %2008 = vmatprep.subr.bf16.mxu0 %v2731_v22  ;;  %2048 = vmatpush2.bf16.msra.mxu1 %v2774_v30 }
 0x126   :  { %2049 = vmatprep.subr.bf16.mxu1 %v2779_v33  ;;  %v2075_v33 = vcombine.high %v2404_v29, %v2404_v29 }
 0x128   :  { %2009 = vmatpush2.bf16.msra.mxu0 %v2729_v25 }
 0x129   :  { %2050 = vmatpush2.bf16.msra.mxu1 %v2777_v34 }
 0x13f   :  { %v1336_v35 = vpop.f32.mrf.mxu0 }
 0x140   :  { %v1377_v36 = vpop.f32.mrf.mxu1  ;;  %v1337_v14 = vadd.f32 %v1336_v35, %v3008_v41  ;;  %v1557_v41 = vrot.slane %v1548_v45, %v1556_v49 }
 0x141   :  { %v1338_v37 = vpop.f32.mrf.mxu0 }
 0x142   :  { %v1379_v38 = vpop.f32.mrf.mxu1  ;;  %v1339_v48 = vadd.f32 %v1338_v37, %v3012_v46  ;;  %v1378_v50 = vadd.f32 %v1377_v36, %v1337_v14 }
 0x143   :  { %v1340_v32 = vpop.f32.mrf.mxu0 }
 0x144   :  { %v1381_v20 = vpop.f32.mrf.mxu1  ;;  %v1380_v53 = vadd.f32 %v1379_v38, %v1339_v48 }
 0x145   :  { %v1341_v39 = vpop.f32.mrf.mxu0 }
 0x146   :  { %v1382_v40 = vpop.f32.mrf.mxu1  ;;  %v1646_v39 = vld [vmem:[%s3054_s6] sm:$0x3] }
 0x147   :  { %v1651_v40 = vrot.slane %v1646_v39, %v1552_v44  ;;  %v1655_v14 = vrot.slane %v1646_v39, %v1556_v49 }
 0x16b   :  { %v1418_v52 = vpop.f32.mrf.mxu0 }
 0x16c   :  { %v1419_v54 = vadd.f32 %v1418_v52, %v1378_v50 }
 0x16d   :  { %v1420_v31 = vpop.f32.mrf.mxu0 }
 0x16e   :  { %v1570_v56 = vadd.f32 %v1553_v51, %v1419_v54  ;;  %v1421_v57 = vadd.f32 %v1420_v31, %v1380_v53 }
 0x16f   :  { %v1422_v58 = vpop.f32.mrf.mxu0 }
 0x170   :  { %v1571_v59 = vadd.f32 %v1557_v41, %v1421_v57  ;;  %v1574_v43 = vmax.f32 %v1570_v56, 0.0 }
 0x171   :  { %v1423_v60 = vpop.f32.mrf.mxu0 }
 0x172   :  { %v1575_v46 = vmax.f32 %v1571_v59, 0.0  ;;  %v1578_v62 = vpack.c.bf16 %v1574_v43, %v1574_v43 }
 0x174   :  { %v1579_v61 = vpack.c.bf16 %v1575_v46, %v1575_v46 }
 0x176   :  { %2010 = vmatprep.mubr.bf16.mxu0 %v1579_v61 }
 0x177   :  { %2011 = vmatmul.mubr.bf16.vlgmr.msra.gmra.mxu0 %v1578_v62 }
 0x180   :  { %v1459_v63 = vpop.f32.mrf.mxu1 }
 0x181   :  { %v1460_v4 = vadd.f32 %v1459_v63, %v3010_v42 }
 0x182   :  { %v1461_v0 = vpop.f32.mrf.mxu1 }
 0x183   :  { %v1462_v8 = vadd.f32 %v1461_v0, %v3014_v47  ;;  %v2898_v47 = vmov 1966171168  }
 0x184   :  { %v1463_v1 = vpop.f32.mrf.mxu1  ;;  %v2077_v28 = vunpack.c.l.s4 %v2898_v47 }
 0x186   :  { %v1464_v2 = vpop.f32.mrf.mxu1  ;;  %v2078_v30 = vunpack.c.0.s8 %v2077_v28 }
 0x188   :  { %v2081_v34 = vsub.s32 %v2078_v30, %v2969_v55  ;;  %v2066_v55 = vstv %s3056_s8 }
 0x18a   :  { %v2089_v35 = vrot.slane %v2075_v33, %v2081_v34  ;;  %v2082_v36 = vrot.slane %v2404_v29, %v2081_v34 }
 0x18c   :  { %2124 = vmatprep.mubr.bf16.mxu0 %v2089_v35 }
 0x1ab   :  { %v1500_v6 = vpop.f32.mrf.mxu0 }
 0x1ac   :  { %v1541_v7 = vpop.f32.mrf.mxu1  ;;  %v1501_v9 = vadd.f32 %v1500_v6, %v1460_v4 }
 0x1ad   :  { %v1502_v11 = vpop.f32.mrf.mxu0 }
 0x1ae   :  { %v1543_v12 = vpop.f32.mrf.mxu1  ;;  %v1542_v13 = vadd.f32 %v1541_v7, %v1501_v9  ;;  %v1503_v15 = vadd.f32 %v1502_v11, %v1462_v8 }
 0x1af   :  { %v1504_v17 = vpop.f32.mrf.mxu0 }
 0x1b0   :  { %v1545_v18 = vpop.f32.mrf.mxu1  ;;  %v1572_v19 = vadd.f32 %v1561_v10, %v1542_v13  ;;  %v1544_v21 = vadd.f32 %v1543_v12, %v1503_v15 }
 0x1b1   :  { %v1505_v22 = vpop.f32.mrf.mxu0 }
 0x1b2   :  { %v1546_v23 = vpop.f32.mrf.mxu1  ;;  %v1573_v42 = vadd.f32 %v1565_v16, %v1544_v21  ;;  %v1576_v24 = vmax.f32 %v1572_v19, 0.0 }
 0x1b4   :  { %v1577_v25 = vmax.f32 %v1573_v42, 0.0  ;;  %v1580_v27 = vpack.c.bf16 %v1576_v24, %v1576_v24 }
 0x1b6   :  { %v1581_v26 = vpack.c.bf16 %v1577_v25, %v1577_v25 }
 0x1b8   :  { %2051 = vmatprep.mubr.bf16.mxu1 %v1581_v26 }
 0x1b9   :  { %2052 = vmatmul.mubr.bf16.vlgmr.msra.gmra.mxu1 %v1580_v27 }
 0x237   :  { %v2012_v37 = vpop.f32.mrf.mxu0 }
 0x238   :  { %v2013_v45 = vadd.f32 %v2012_v37, %v1651_v40 }
 0x239   :  { %v2014_v38 = vpop.f32.mrf.mxu0 }
 0x23a   :  { %v2015_v50 = vadd.f32 %v2014_v38, %v1655_v14 }
 0x23b   :  { %v2016_v32 = vpop.f32.mrf.mxu0 }
 0x23d   :  { %v2017_v20 = vpop.f32.mrf.mxu0 }
 0x279   :  { %v2053_v48 = vpop.f32.mrf.mxu1 }
 0x27a   :  { %v2054_v51 = vadd.f32 %v2053_v48, %v2013_v45 }
 0x27b   :  { %v2055_v52 = vpop.f32.mrf.mxu1 }
 0x27c   :  { %v2056_v53 = vadd.f32 %v2055_v52, %v2015_v50  ;;  %v2060_v54 = vmax.f32 %v2054_v51, 0.0 }
 0x27d   :  { %v2057_v41 = vpop.f32.mrf.mxu1 }
 0x27e   :  { %v2061_v31 = vmax.f32 %v2056_v53, 0.0  ;;  %v2063_v58 = vpack.c.bf16 %v2060_v54, %v2060_v54 }
 0x27f   :  { %v2058_v56 = vpop.f32.mrf.mxu1 }
 0x280   :  { %v2064_v57 = vpack.c.bf16 %v2061_v31, %v2061_v31 }
 0x282   :  { %2106 = vmatprep.subr.bf16.mxu0 %v2064_v57 }
 0x283   :  { %2107 = vmatpush1.bf16.xpose.msra.mxu0 %v2063_v58 }
 0x28a   :  { %2125 = vmatmul.mubr.bf16.vlgmr.msra.gmra.mxu0 %v2082_v36 }
 0x34a   :  { %v2126_v44 = vpop.f32.mrf.mxu0 }
 0x34b   :  { %v2127_v49 = vadd.f32 %v2126_v44, %v2066_v55 }
 0x34c   :  { %v2128_v59 = vpop.f32.mrf.mxu0 }
 0x34d   :  { %2133 = vst.msk [vmem:[#allocation11] sm:$0x1] %vm2132_vm3, %v2127_v49 }
 0x34e   :  { %v2129_v43 = vpop.f32.mrf.mxu0 }
 0x34f   :  { %2871 = shalt.err (!%p2868_p10)
}
 0x350   :  { %2143 = dma.vmem_to_hbm [thread:$0]  %s2141_s15, 16, %s3057_s9, [#allocation5]   ;;  %v2130_v60 = vpop.f32.mrf.mxu0 }
 0x351   :  { %2886 = dma.done.wait [#allocation5], 16  }
 0x352   :  { %2887 = vsyncadd [#allocation5], 4294967280 }
 0x353   :  { %2147 = vsyncpa [#allocation4], 1 }
 0x354   :  { %2148 = vsyncpa [#allocation7], 1 }
 0x355   :  { %2149 = vsyncpa [#allocation10], 1 }
 0x356   :  { %2150 = vsyncpa [#allocation5], 1 }

</bundles_post_ra>
